<compile_context>
chip_gen: v7x
topology: tpu7x:2x2x1
jax: 0.10.0
libtpu: 0.0.40
codegen_flags: <defaults>
</compile_context>

<pallas_src>
import math
import functools

import jax
import jax.numpy as jnp
from jax.experimental import pallas as pl
from jax.experimental.pallas import tpu as pltpu


def _sdpa_kernel(q_ref, k_ref, v_ref, out_ref, logit_ref, third_ref,
                 *, inv_temperature, full_log_attn, mxu_input_dtype):
    # Blocks: q (TB, TQ, D), k (TB, Nk, D), v (TB, Nk, Dv).
    q = q_ref[...]
    k = k_ref[...]
    v = v_ref[...]

    if mxu_input_dtype is not None:
        # Optional MXU precision knob (e.g. bf16 on v5e's no-native-f32 MXU).
        q = q.astype(mxu_input_dtype)
        k = k.astype(mxu_input_dtype)
        v = v.astype(mxu_input_dtype)

    # attn_logit = q @ k^T per batch element; contraction over D expressed
    # directly (no explicit k.T on the critical path), f32 accumulation.
    logits = jnp.einsum('bqd,bkd->bqk', q, k,
                        preferred_element_type=jnp.float32)     # (TB, TQ, Nk)

    # Store attn_logit now so the f32 logits temporary dies before softmax.
    logit_ref[...] = logits.astype(logit_ref.dtype)

    scaled = logits * inv_temperature

    # Numerically stable softmax / log_softmax over the last axis, with a
    # single (TB, TQ, Nk) transcendental pass through the EUP.
    m = jnp.max(scaled, axis=-1, keepdims=True)
    shifted = scaled - m
    p = jnp.exp(shifted)                                        # one exp pass
    s = jnp.sum(p, axis=-1, keepdims=True)                      # (TB, TQ, 1)
    attn = p * (1.0 / s)          # exact reciprocal of tiny s; VPU broadcast
    log_s = jnp.log(s)

    if full_log_attn:
        third_ref[...] = (shifted - log_s).astype(third_ref.dtype)
    else:
        # logsumexp of the scaled logits; log_attn = scaled - lse downstream.
        third_ref[...] = (m + log_s).astype(third_ref.dtype)

    # output = attn @ v (dropout is identity in eval mode).
    out = jnp.einsum('bqk,bkd->bqd', attn.astype(v.dtype), v,
                     preferred_element_type=jnp.float32)        # (TB, TQ, Dv)
    out_ref[...] = out.astype(out_ref.dtype)


def _vmem_capacity_bytes():
    """Per-TensorCore VMEM capacity; conservative fallback if query fails."""
    try:
        return int(pltpu.get_tpu_info().vmem_capacity_bytes)
    except Exception:
        return 64 * 1024 * 1024          # v7x has the smallest VMEM (64 MiB)


def _pick_tiles(B, Nq, Nk, D, Dv, in_bytes, out_bytes, logit_bytes,
                third_cols, third_bytes, sub_mult, vmem_budget):
    """Pick (TB, TQ) so the pipelined working set fits vmem_budget while the
    grid keeps enough parallel steps for megacore sharding + pipelining."""

    def cost(tb, tq):
        kv_bufs = 1 if tb == B else 2    # resident K/V -> single-buffered
        q_b = 2 * tb * tq * D * in_bytes
        k_b = kv_bufs * tb * Nk * D * in_bytes
        v_b = kv_bufs * tb * Nk * Dv * in_bytes
        o_b = 2 * tb * tq * Dv * out_bytes
        l_b = 2 * tb * tq * Nk * logit_bytes
        t_b = 2 * tb * tq * third_cols * third_bytes
        interm = 5 * tb * tq * Nk * 4    # live f32 softmax intermediates
        return q_b + k_b + v_b + o_b + l_b + t_b + interm

    # TQ candidates: full Nq (always layout-legal) plus divisors respecting
    # the dtype's minimum sublane tile (8 f32 / 16 bf16 / 32 int8|fp8).
    tq_cands = {Nq}
    for t in (1024, 512, 256, 128, 64, 32, 16, 8):
        if t % sub_mult == 0 and t <= Nq and Nq % t == 0:
            tq_cands.add(t)
    tq_cands = sorted(tq_cands, reverse=True)
    min_tq = min(tq_cands)

    # TB candidates: divisors of B, largest first.
    tb_cands = [t for t in range(B, 0, -1) if B % t == 0]

    # Keep >= 2 grid steps (>= 4 for big problems) when the shape allows it:
    # v7x shards parallel grid axes across its two TensorCores and all
    # generations regain prefetch/writeback overlap.
    max_steps = B * (Nq // min_tq)
    problem_bytes = (B * Nq * (Nk * logit_bytes + third_cols * third_bytes
                               + Dv * out_bytes)
                     + B * (Nq * D + Nk * (D + Dv)) * in_bytes)
    target_steps = 4 if problem_bytes >= 8 * 1024 * 1024 else 2
    target_steps = min(target_steps, max_steps)

    best = None
    for tq in tq_cands:
        for tb in tb_cands:
            if (B // tb) * (Nq // tq) < target_steps:
                continue
            c = cost(tb, tq)
            if c > vmem_budget:
                continue
            score = (tb * tq, tq)
            if best is None or score > best[0]:
                best = (score, tb, tq, c)
    if best is None:
        raise ValueError(
            "ScaledDotProductAttention pallas kernel: even the minimal tile "
            f"(TB=1, TQ={min_tq}) exceeds the VMEM budget ({vmem_budget} B) "
            f"for Nk={Nk}. TODO(synk): add an Nk-tiled two-pass softmax path "
            "for long key sequences.")
    _, TB, TQ, est = best
    return TB, TQ, est


def scaled_dot_product_attention(q, k, v, temperature, *,
                                 logits_dtype=None,
                                 full_log_attn=True,
                                 mxu_input_dtype=None):
    """q: (B, Nq, D), k: (B, Nk, D), v: (B, Nk, Dv)
    -> (output, attn_logit, log_attn)   [log_attn is (B,Nq,1) logsumexp if
                                         full_log_attn=False]."""
    B, Nq, D = q.shape
    Bk, Nk, Dk = k.shape
    Dv = v.shape[-1]
    assert Bk == B and Dk == D and v.shape[0] == B and v.shape[1] == Nk

    if logits_dtype is None:
        logits_dtype = q.dtype           # match torch: outputs in input dtype

    in_bytes = jnp.dtype(q.dtype).itemsize
    out_bytes = in_bytes
    logit_bytes = jnp.dtype(logits_dtype).itemsize
    third_cols = Nk if full_log_attn else 1
    third_dtype = logits_dtype if full_log_attn else jnp.float32
    third_bytes = jnp.dtype(third_dtype).itemsize

    # Minimum sublane multiple for the narrowest dtype on a (TQ, *) block dim.
    min_itemsize = min(in_bytes, out_bytes, logit_bytes)
    sub_mult = {1: 32, 2: 16}.get(min_itemsize, 8)

    # Generation-dependent VMEM budget (v5e/v6e: 128 MiB, v7x: 64 MiB per TC).
    vmem_cap = _vmem_capacity_bytes()
    vmem_budget = int(vmem_cap * 0.45)

    TB, TQ, est_cost = _pick_tiles(B, Nq, Nk, D, Dv, in_bytes, out_bytes,
                                   logit_bytes, third_cols, third_bytes,
                                   sub_mult, vmem_budget)

    kernel = functools.partial(
        _sdpa_kernel,
        inv_temperature=1.0 / float(temperature),
        full_log_attn=full_log_attn,
        mxu_input_dtype=mxu_input_dtype)

    grid = (B // TB, Nq // TQ)   # q-tile axis innermost -> K/V stay resident

    kv_map = lambda b, i: (b, 0, 0)
    if TB == B:
        # Batch axis has a single step: K/V blocks never change, so skip
        # double-buffering them (reclaims VMEM for bigger q tiles).
        k_spec = pl.BlockSpec((TB, Nk, D), kv_map, pipeline_mode=pl.Buffered(1))
        v_spec = pl.BlockSpec((TB, Nk, Dv), kv_map, pipeline_mode=pl.Buffered(1))
    else:
        k_spec = pl.BlockSpec((TB, Nk, D), kv_map)
        v_spec = pl.BlockSpec((TB, Nk, Dv), kv_map)

    grid_spec = pltpu.PrefetchScalarGridSpec(
        num_scalar_prefetch=0,
        grid=grid,
        in_specs=[
            pl.BlockSpec((TB, TQ, D), lambda b, i: (b, i, 0)),
            k_spec,
            v_spec,
        ],
        out_specs=[
            pl.BlockSpec((TB, TQ, Dv), lambda b, i: (b, i, 0)),
            pl.BlockSpec((TB, TQ, Nk), lambda b, i: (b, i, 0)),
            pl.BlockSpec((TB, TQ, third_cols), lambda b, i: (b, i, 0)),
        ],
    )

    out_shapes = (
        jax.ShapeDtypeStruct((B, Nq, Dv), q.dtype),           # output
        jax.ShapeDtypeStruct((B, Nq, Nk), logits_dtype),      # attn_logit
        jax.ShapeDtypeStruct((B, Nq, third_cols), third_dtype),  # log_attn/lse
    )

    vmem_limit = max(32 * 1024 * 1024, est_cost + 16 * 1024 * 1024)
    vmem_limit = int(min(vmem_limit, int(vmem_cap * 0.85)))

    return pl.pallas_call(
        kernel,
        out_shape=out_shapes,
        grid_spec=grid_spec,
        compiler_params=pltpu.CompilerParams(
            dimension_semantics=("parallel", "parallel"),
            vmem_limit_bytes=vmem_limit),
    )(q, k, v)


def _reference(q, k, v, temperature):
    logits = jnp.einsum('bqd,bkd->bqk', q, k)
    scaled = logits / temperature
    attn = jax.nn.softmax(scaled, axis=2)
    log_attn = jax.nn.log_softmax(scaled, axis=2)
    out = jnp.einsum('bqk,bkd->bqd', attn, v)
    return out, logits, log_attn


if __name__ == "__main__":
    key = jax.random.PRNGKey(0)
    kq, kk, kv = jax.random.split(key, 3)

    B, N, D = 2, 8, 32
    temperature = math.sqrt(D)

    q = jax.random.normal(kq, (B, N, D), dtype=jnp.float32)
    k = jax.random.normal(kk, (B, N, D), dtype=jnp.float32)
    v = jax.random.normal(kv, (B, N, D), dtype=jnp.float32)

    out, attn_logit, log_attn = scaled_dot_product_attention(q, k, v, temperature)
    jax.block_until_ready((out, attn_logit, log_attn))

    ref_out, ref_logit, ref_log_attn = _reference(q, k, v, temperature)
    assert jnp.allclose(out, ref_out, atol=1e-5, rtol=1e-5)
    assert jnp.allclose(attn_logit, ref_logit, atol=1e-5, rtol=1e-5)
    assert jnp.allclose(log_attn, ref_log_attn, atol=1e-5, rtol=1e-5)

    print("KERNEL_OK")
</pallas_src>

<mosaic_0001>
module attributes {stable_mosaic.version = 11 : i64} {
  func.func @_sdpa_kernel(%arg0: i32, %arg1: i32, %arg2: memref<1x8x32xf32, #tpu.memory_space<vmem>>, %arg3: memref<1x8x32xf32, #tpu.memory_space<vmem>>, %arg4: memref<1x8x32xf32, #tpu.memory_space<vmem>>, %arg5: memref<1x8x32xf32, #tpu.memory_space<vmem>>, %arg6: memref<1x8x8xf32, #tpu.memory_space<vmem>>, %arg7: memref<1x8x8xf32, #tpu.memory_space<vmem>>) attributes {dimension_semantics = [#tpu.dimension_semantics<parallel>, #tpu.dimension_semantics<parallel>], iteration_bounds = array<i64: 2, 1>, scalar_prefetch = 0 : i64, scratch_operands = 0 : i64, tpu.core_type = #tpu.core_type<tc>, window_params = [{transform_indices = @transform_0, window_bounds = array<i64: 1, 8, 32>}, {transform_indices = @transform_1, window_bounds = array<i64: 1, 8, 32>}, {transform_indices = @transform_2, window_bounds = array<i64: 1, 8, 32>}, {transform_indices = @transform_3, window_bounds = array<i64: 1, 8, 32>}, {transform_indices = @transform_4, window_bounds = array<i64: 1, 8, 8>}, {transform_indices = @transform_5, window_bounds = array<i64: 1, 8, 8>}]} {
    %c0 = arith.constant 0 : index
    %c0_0 = arith.constant 0 : index
    %c0_1 = arith.constant 0 : index
    %0 = vector.load %arg2[%c0, %c0_0, %c0_1] : memref<1x8x32xf32, #tpu.memory_space<vmem>>, vector<1x8x32xf32>
    %c0_2 = arith.constant 0 : index
    %c0_3 = arith.constant 0 : index
    %c0_4 = arith.constant 0 : index
    %1 = vector.load %arg3[%c0_2, %c0_3, %c0_4] : memref<1x8x32xf32, #tpu.memory_space<vmem>>, vector<1x8x32xf32>
    %c0_5 = arith.constant 0 : index
    %c0_6 = arith.constant 0 : index
    %c0_7 = arith.constant 0 : index
    %2 = vector.load %arg4[%c0_5, %c0_6, %c0_7] : memref<1x8x32xf32, #tpu.memory_space<vmem>>, vector<1x8x32xf32>
    "tpu.trace_start"() <{level = 10 : i32, message = "bqd,bkd->bqk"}> : () -> ()
    %cst = arith.constant dense<0.000000e+00> : vector<1x8x8xf32>
    %3 = tpu.matmul %0, %1, %cst {dimension_numbers = #tpu.dot_dimension_numbers<[2], [2], [1], [1], [0, 0, 0, 1, 1, 1], [0], [0]>} : vector<1x8x32xf32>, vector<1x8x32xf32>, vector<1x8x8xf32> -> vector<1x8x8xf32>
    "tpu.trace_stop"() : () -> ()
    %c0_8 = arith.constant 0 : index
    %c0_9 = arith.constant 0 : index
    %c0_10 = arith.constant 0 : index
    %4 = vector.load %arg6[%c0_8, %c0_9, %c0_10] : memref<1x8x8xf32, #tpu.memory_space<vmem>>, vector<1x8x8xf32>
    tpu.vector_store %arg6[%c0_8, %c0_9, %c0_10], %3 {strides = array<i32>} : memref<1x8x8xf32, #tpu.memory_space<vmem>>, vector<1x8x8xf32>,
    %cst_11 = arith.constant 0.176776692 : f32
    %5 = vector.broadcast %cst_11 : f32 to vector<1x8x8xf32>
    %6 = arith.mulf %3, %5 : vector<1x8x8xf32>
    %cst_12 = arith.constant dense<0xFF800000> : vector<1x8xf32>
    %7 = vector.multi_reduction <maximumf>, %6, %cst_12 [2] : vector<1x8x8xf32> to vector<1x8xf32>
    %8 = vector.shape_cast %7 : vector<1x8xf32> to vector<1x8x1xf32>
    %9 = vector.broadcast %8 : vector<1x8x1xf32> to vector<1x8x8xf32>
    %10 = arith.subf %6, %9 : vector<1x8x8xf32>
    %11 = math.exp %10 : vector<1x8x8xf32>
    %cst_13 = arith.constant dense<0.000000e+00> : vector<1x8xf32>
    %12 = vector.multi_reduction <add>, %11, %cst_13 [2] : vector<1x8x8xf32> to vector<1x8xf32>
    %13 = vector.shape_cast %12 : vector<1x8xf32> to vector<1x8x1xf32>
    %cst_14 = arith.constant 1.000000e+00 : f32
    %14 = vector.broadcast %cst_14 : f32 to vector<1x8x1xf32>
    %15 = arith.divf %14, %13 : vector<1x8x1xf32>
    %16 = vector.broadcast %15 : vector<1x8x1xf32> to vector<1x8x8xf32>
    %17 = arith.mulf %11, %16 : vector<1x8x8xf32>
    %18 = math.log %13 : vector<1x8x1xf32>
    %19 = vector.broadcast %18 : vector<1x8x1xf32> to vector<1x8x8xf32>
    %20 = arith.subf %10, %19 : vector<1x8x8xf32>
    %c0_15 = arith.constant 0 : index
    %c0_16 = arith.constant 0 : index
    %c0_17 = arith.constant 0 : index
    %21 = vector.load %arg7[%c0_15, %c0_16, %c0_17] : memref<1x8x8xf32, #tpu.memory_space<vmem>>, vector<1x8x8xf32>
    tpu.vector_store %arg7[%c0_15, %c0_16, %c0_17], %20 {strides = array<i32>} : memref<1x8x8xf32, #tpu.memory_space<vmem>>, vector<1x8x8xf32>,
    "tpu.trace_start"() <{level = 10 : i32, message = "bqk,bkd->bqd"}> : () -> ()
    %cst_18 = arith.constant dense<0.000000e+00> : vector<1x8x32xf32>
    %22 = tpu.matmul %17, %2, %cst_18 {dimension_numbers = #tpu.dot_dimension_numbers<[2], [1], [1], [2], [0, 0, 0, 1, 1, 2], [0], [0]>} : vector<1x8x8xf32>, vector<1x8x32xf32>, vector<1x8x32xf32> -> vector<1x8x32xf32>
    "tpu.trace_stop"() : () -> ()
    %c0_19 = arith.constant 0 : index
    %c0_20 = arith.constant 0 : index
    %c0_21 = arith.constant 0 : index
    %23 = vector.load %arg5[%c0_19, %c0_20, %c0_21] : memref<1x8x32xf32, #tpu.memory_space<vmem>>, vector<1x8x32xf32>
    tpu.vector_store %arg5[%c0_19, %c0_20, %c0_21], %22 {strides = array<i32>} : memref<1x8x32xf32, #tpu.memory_space<vmem>>, vector<1x8x32xf32>,
    return
  }
  func.func @transform_0(%arg0: i32, %arg1: i32) -> (i32, i32, i32) {
    %c0_i32 = arith.constant 0 : i32
    %c0_i32_0 = arith.constant 0 : i32
    return %arg0, %arg1, %c0_i32 : i32, i32, i32
  }
  func.func @transform_1(%arg0: i32, %arg1: i32) -> (i32, i32, i32) {
    %c0_i32 = arith.constant 0 : i32
    %c0_i32_0 = arith.constant 0 : i32
    %c0_i32_1 = arith.constant 0 : i32
    return %arg0, %c0_i32, %c0_i32_0 : i32, i32, i32
  }
  func.func @transform_2(%arg0: i32, %arg1: i32) -> (i32, i32, i32) {
    %c0_i32 = arith.constant 0 : i32
    %c0_i32_0 = arith.constant 0 : i32
    %c0_i32_1 = arith.constant 0 : i32
    return %arg0, %c0_i32, %c0_i32_0 : i32, i32, i32
  }
  func.func @transform_3(%arg0: i32, %arg1: i32) -> (i32, i32, i32) {
    %c0_i32 = arith.constant 0 : i32
    %c0_i32_0 = arith.constant 0 : i32
    return %arg0, %arg1, %c0_i32 : i32, i32, i32
  }
  func.func @transform_4(%arg0: i32, %arg1: i32) -> (i32, i32, i32) {
    %c0_i32 = arith.constant 0 : i32
    %c0_i32_0 = arith.constant 0 : i32
    return %arg0, %arg1, %c0_i32 : i32, i32, i32
  }
  func.func @transform_5(%arg0: i32, %arg1: i32) -> (i32, i32, i32) {
    %c0_i32 = arith.constant 0 : i32
    %c0_i32_0 = arith.constant 0 : i32
    return %arg0, %arg1, %c0_i32 : i32, i32, i32
  }
}

</mosaic_0001>

<bundles_post_ra>
// kernel: tpu_custom_call.1
= control target key start
LH: loop header
LB: loop body
LE: loop exit
PB: predicated region body
PF: predicated region fallthrough
CT: control target
= control target key end

     0   :  { %s1509_s0 = inlined_call_operand.hbm [shape: f32[2,8,32], index: 0, kind: input, shape index: {}]   ;;  %s1510_s1 = inlined_call_operand.hbm [shape: f32[2,8,32], index: 1, kind: input, shape index: {}]   ;;  %s1511_s2 = inlined_call_operand.hbm [shape: f32[2,8,32], index: 2, kind: input, shape index: {}]   ;;  %s1512_s3 = inlined_call_operand.hbm [shape: f32[2,8,32], index: 3, kind: output, shape index: {0}]   ;;  %s1513_s4 = inlined_call_operand.hbm [shape: f32[2,8,8], index: 4, kind: output, shape index: {1}]   ;;  %s1514_s5 = inlined_call_operand.hbm [shape: f32[2,8,8], index: 5, kind: output, shape index: {2}]  }
   0x1   :  { %1525 = sst [smem:[#allocation21_spill]] %s1510_s1 }
   0x2   :  { %11 = vsyncpa [#allocation3], 0 }
   0x3   :  { %13 = vsyncpa [#allocation3 + $0x1], 0 }
   0x4   :  { %14 = vsyncpa [#allocation6], 0 }
   0x5   :  { %16 = vsyncpa [#allocation6 + $0x1], 0 }
   0x6   :  { %17 = vsyncpa [#allocation4], 0 }
   0x7   :  { %19 = vsyncpa [#allocation4 + $0x1], 0 }
   0x8   :  { %20 = vsyncpa [#allocation10], 0 }
   0x9   :  { %22 = vsyncpa [#allocation10 + $0x1], 0  ;;  %s1170_s18 = smov 0   ;;  %s1172_s19 = smov 0  }
   0xa   :  { %s1174_s20 = smov 0   ;;  %s1176_s21 = smov 0  }
   0xb   :  { %s1178_s22 = smov 0   ;;  %s1180_s23 = smov 0  }
   0xc LB: > { %1526 = sst [smem:[#allocation16_spill]] %s1126_s22  ;;  %s1201_s24 = sadd.s32 4294967295, %s1130_s23   ;;  %s1130_s23 = sphi %s1180_s23, %s28_s23   ;;  %s1126_s22 = sphi %s1178_s22, %s1553_s22   ;;  %s1122_s21 = sphi %s1176_s21, %s1552_s21   ;;  %s1118_s20 = sphi %s1174_s20, %s1556_s20   ;;  %s1114_s19 = sphi %s1172_s19, %s1555_s19   ;;  %s1110_s18 = sphi %s1170_s18, %s1554_s18  }
   0xd   : > { %1527 = sst [smem:[#allocation17_spill]] %s1130_s23  ;;  %s1515_s25 = sadd.s32 4294967294, %s1130_s23  }
   0xe   : > { %s40_s26 = sadd.s32 1, %s1126_s22  ;;  %s49_s27 = sadd.s32 1, %s1118_s20 }
   0xf   : > { %p42_p0 = scmp.ge.s32.totalorder %s40_s26, 2  ;;  %p56_p1 = scmp.ne.s32.totalorder %s1118_s20, %s1114_s19 }
  0x10   : > { %p57_p2 = scmp.eq.s32.totalorder %s1130_s23, 0  ;;  %p62_p3 = scmp.ne.s32.totalorder %s1114_s19, %s1110_s18 }
  0x11   : > { %s1558_s26 = smov (%p42_p0, %s40_s26), 0  ;;  %p63_p5 = scmp.eq.s32.totalorder %s1201_s24, 0 }
  0x12   : > { %1528 = sst [smem:[#allocation18_spill]] %s1558_s26  ;;  %p1213_p4 = por %p57_p2, %p56_p1 }
  0x13   : > { %s44_s29 = ssub.s32 %s1126_s22, %s1558_s26  ;;  %p140_p6 = scmp.eq.s32.totalorder %s1201_s24, 1 }
  0x14   : > { %p47_p7 = scmp.eq.s32.totalorder %s44_s29, 0  ;;  %p1221_p8 = por %p63_p5, %p62_p3 }
  0x15   : > { %p1225_p9 = por %p140_p6, %p56_p1  ;;  %p146_p10 = scmp.eq.s32.totalorder %s1515_s25, 1 }
  0x16   : > { %s1530_s30 = scalar_select %p1221_p8, 1, 0 }
  0x17   : > { %s1531_s6 = scalar_select %p1225_p9, 1, 0 }
  0x18   : > { %s1232_s7 = scalar_select %p47_p7, %s1118_s20, %s49_s27  }
  0x19   : > { %p1234_p11 = por %p146_p10, %p62_p3  ;;  %p836_p13 = scmp.lt.s32.totalorder %s1130_s23, 2 }
  0x1a   : > { %1532 = sst [smem:[#allocation19_spill]] %s1232_s7  ;;  %s1516_s9 = sand.u32 1, %s1118_s20  }
  0x1b   : > { %s1533_s8 = scalar_select %p1234_p11, 1, 0 }
  0x1c   : > { %s1243_s10 = sshll.u32 %s1516_s9, 3  ;;  %s1246_s11 = sshll.u32 %s1126_s22, 7 }
  0x1d   : > { %1534 = sst [smem:[#allocation20_spill]] %s1533_s8  ;;  %p1250_p0 = pnand %p836_p13, %p1213_p4 }
  0x1e   : > { %s241_s13 = sand.u32 1, %s1130_s23   ;;  %s1536_s1 = sld [smem:[#allocation21_spill]] }
  0x1f   : > { %s1535_s12 = scalar_select %p1250_p0, 1, 0 }
  0x20   : > { %s245_s17 = scalar_lea.vmem [#allocation5], %s1243_s10  ;;  %s1266_s28 = scalar_lea.sflag [#allocation6], %s241_s13 }
  0x21   : > { %s252_s27 = sshll.u32 %s245_s17, 4  ;;  %p1272_p4 = pneg %p1250_p0  ;;  %s1263_s27 = int_to_ptr.vmem [resolvable:$true] %s252_s27 }
  0x24   : > { %s1259_s16 = scalar_lea.hbm %s1536_s1, %s1246_s11  ;;  %s899_s17 = scalar_lea.hbm %s1536_s1, 256 }
  0x25   : > { %s894_s29 = scalar_lea.hbm %s1259_s16, 128  ;;  %p900_p7 = scmp.lt.u32.totalorder %s1259_s16, %s1536_s1 }
  0x26   : > { %p895_p3 = scmp.ne.s32.totalorder %s1259_s16, %s894_s29  ;;  %p901_p10 = scmp.lt.u32.totalorder %s899_s17, %s894_s29 }
  0x27   : > { %p903_p12 = scmp.lt.u32.totalorder %s894_s29, %s1259_s16 }
  0x28   : > { %p897_p5 = pnand %p1272_p4, %p895_p3  ;;  %p902_p13 = por %p901_p10, %p900_p7 }
  0x2a   : > { %p898_p6 = pneg %p897_p5  ;;  %p904_p1 = por %p903_p12, %p902_p13 }
  0x2c   : > { %p905_p2 = pnand %p904_p1, %p898_p6 }
  0x2e   : > { %908 = shalt.err (!%p905_p2)
}
  0x2f   : > { %s909_s13 = scalar_lea.vmem %s1263_s27, 128  ;;  %s1132_s14 = smov [#allocation5]  }
  0x30   : > { %p910_p3 = scmp.ne.s32.totalorder %s1263_s27, %s909_s13  ;;  %s914_s15 = sshll.u32 %s1132_s14, 4  ;;  %s915_s15 = int_to_ptr.vmem [resolvable:$false] %s914_s15 }
  0x31   : > { %s916_s26 = scalar_lea.vmem %s915_s15, 256  ;;  %p917_p9 = scmp.lt.s32.totalorder %s1263_s27, %s915_s15 }
  0x32   : > { %p912_p5 = pnand %p910_p3, %p1272_p4  ;;  %p918_p8 = scmp.lt.s32.totalorder %s916_s26, %s909_s13 }
  0x34   : > { %p913_p11 = pneg %p912_p5  ;;  %p919_p7 = por %p918_p8, %p917_p9 }
  0x36   : > { %p920_p10 = pnand %p919_p7, %p913_p11 }
  0x38   : > { %923 = shalt.err (!%p920_p10)
}
  0x39   : > { %822 = dma.hbm_to_vmem [thread:$0]  (!%p1250_p0), %s1259_s16, 128, %s1263_s27, %s1266_s28  }
  0x3a   : > { %p1538_p12 = scmp.lt.s32.totalorder %s1130_s23, 3  ;;  %p1539_p1 = scmp.ge.s32.totalorder %s1130_s23, 1 }
  0x3b   : > { %s1308_s13 = scalar_lea.hbm %s1509_s0, %s1246_s11  ;;  %s226_s14 = scalar_lea.vmem [#allocation2], %s1243_s10 }
  0x3c   : > { %p1300_p2 = pnand %p1539_p1, %p1538_p12  ;;  %s234_s15 = sshll.u32 %s226_s14, 4  ;;  %s1311_s15 = int_to_ptr.vmem [resolvable:$true] %s234_s15 }
  0x3d   : > { %s1317_s26 = scalar_lea.hbm %s1511_s2, %s1246_s11  ;;  %s1541_s1 = sand.u32 1, %s1118_s20  }
  0x3e   : > { %s1540_s9 = scalar_select %p1300_p2, 1, 0 }
  0x3f   : > { %s223_s22 = scalar_lea.sflag [#allocation3], %s1541_s1  ;;  %s924_s7 = scalar_lea.hbm %s1308_s13, 128 }
  0x40   : > { %p925_p8 = scmp.ne.s32.totalorder %s1308_s13, %s924_s7  ;;  %s929_s23 = scalar_lea.hbm %s1509_s0, 256 }
  0x41   : > { %p930_p6 = scmp.lt.u32.totalorder %s1308_s13, %s1509_s0  ;;  %p931_p13 = scmp.lt.u32.totalorder %s929_s23, %s924_s7 }
  0x42   : > { %p927_p9 = pnand %p925_p8, %p1272_p4  ;;  %p933_p5 = scmp.lt.u32.totalorder %s924_s7, %s1308_s13 }
  0x43   : > { %p932_p3 = por %p931_p13, %p930_p6 }
  0x44   : > { %p928_p11 = pneg %p927_p9 }
  0x45   : > { %p934_p7 = por %p933_p5, %p932_p3 }
  0x47   : > { %p935_p10 = pnand %p934_p7, %p928_p11 }
  0x49   : > { %938 = shalt.err (!%p935_p10)
}
  0x4a   : > { %s939_s1 = scalar_lea.vmem %s1311_s15, 128  ;;  %s1133_s11 = smov [#allocation2]  }
  0x4b   : > { %p940_p12 = scmp.ne.s32.totalorder %s1311_s15, %s939_s1  ;;  %s944_s16 = sshll.u32 %s1133_s11, 4  ;;  %s945_s16 = int_to_ptr.vmem [resolvable:$false] %s944_s16 }
  0x4c   : > { %s946_s8 = scalar_lea.vmem %s945_s16, 256  ;;  %p947_p9 = scmp.lt.s32.totalorder %s1311_s15, %s945_s16 }
  0x4d   : > { %p942_p1 = pnand %p940_p12, %p1272_p4  ;;  %p948_p2 = scmp.lt.s32.totalorder %s946_s8, %s939_s1 }
  0x4f   : > { %p943_p8 = pneg %p942_p1  ;;  %p949_p6 = por %p948_p2, %p947_p9 }
  0x51   : > { %p950_p13 = pnand %p949_p6, %p943_p8 }
  0x53   : > { %953 = shalt.err (!%p950_p13)
}
  0x54   : > { %819 = dma.hbm_to_vmem [thread:$0]  (!%p1250_p0), %s1308_s13, 128, %s1311_s15, %s223_s22  }
  0x55   : > { %s263_s23 = scalar_lea.vmem [#allocation7], %s1243_s10  ;;  %s954_s27 = scalar_lea.hbm %s1317_s26, 128 }
  0x56   : > { %s270_s7 = sshll.u32 %s263_s23, 4  ;;  %p955_p11 = scmp.ne.s32.totalorder %s1317_s26, %s954_s27  ;;  %s271_s7 = int_to_ptr.vmem [resolvable:$true] %s270_s7 }
  0x57   : > { %s959_s14 = scalar_lea.hbm %s1511_s2, 256  ;;  %p960_p5 = scmp.lt.u32.totalorder %s1317_s26, %s1511_s2 }
  0x58   : > { %p957_p2 = pnand %p955_p11, %p1272_p4  ;;  %p961_p7 = scmp.lt.u32.totalorder %s959_s14, %s954_s27 }
  0x59   : > { %p963_p12 = scmp.lt.u32.totalorder %s954_s27, %s1317_s26 }
  0x5a   : > { %p958_p3 = pneg %p957_p2  ;;  %p962_p10 = por %p961_p7, %p960_p5 }
  0x5c   : > { %p964_p1 = por %p963_p12, %p962_p10 }
  0x5e   : > { %p965_p8 = pnand %p964_p1, %p958_p3 }
  0x60   : > { %968 = shalt.err (!%p965_p8)
}
  0x61   : > { %s969_s22 = scalar_lea.vmem %s271_s7, 128  ;;  %s1134_s10 = smov [#allocation7]  }
  0x62   : > { %p970_p9 = scmp.ne.s32.totalorder %s271_s7, %s969_s22  ;;  %s974_s13 = sshll.u32 %s1134_s10, 4  ;;  %s975_s13 = int_to_ptr.vmem [resolvable:$false] %s974_s13 }
  0x63   : > { %s976_s15 = scalar_lea.vmem %s975_s13, 256  ;;  %p977_p11 = scmp.lt.s32.totalorder %s271_s7, %s975_s13 }
  0x64   : > { %p972_p6 = pnand %p970_p9, %p1272_p4  ;;  %p978_p2 = scmp.lt.s32.totalorder %s976_s15, %s969_s22 }
  0x66   : > { %p973_p13 = pneg %p972_p6  ;;  %p979_p0 = por %p978_p2, %p977_p11 }
  0x68   : > { %p980_p5 = pnand %p979_p0, %p973_p13 }
  0x6a   : > { %983 = shalt.err (!%p980_p5)
}
  0x6b   : > { %p1542_p7 = scmp.ne.s32.totalorder %s1535_s12, 0  ;;  %p1543_p3 = scmp.ne.s32.totalorder %s1540_s9, 0 }
  0x6c   : > { %s1364_s25 = sand.u32 (!%p1543_p3), 1, %s1114_s19   ;;  %p1544_p0 = scmp.ne.s32.totalorder (!%p1543_p3), %s1530_s30, 0 }
  0x6d   : > { %825 = dma.hbm_to_vmem [thread:$0]  (!%p1542_p7), %s1317_s26, 128, %s271_s7, %s1266_s28  }
  0x6e   : > { %279 = sbr.rel (%p1543_p3) target bundleno = 881 (0x371), region = 32  ;;  %s1367_s16 = sshll.u32 (!%p1543_p3), %s1364_s25, 3 }
  0x6f   : > { %s282_s8 = scalar_lea.sflag (!%p1543_p3), [#allocation3], %s1364_s25  ;;  %s285_s23 = scalar_lea.vmem (!%p1543_p3), [#allocation2], %s1367_s16 }
  0x75   : > { %1093 = dma.done.wait (%p1544_p0), %s282_s8, 128  }
  0x76   : > { %1095 = vsyncadd (%p1544_p0), %s282_s8, 4294967168  ;;  %s290_s12 = sand.u32 1, %s1201_s24   ;;  %s294_s9 = scalar_lea.vmem [#allocation5], %s1367_s16 }
  0x77   : > { %s291_s28 = scalar_lea.sflag [#allocation6], %s290_s12 }
  0x78   : > { %1097 = dma.done.wait (%p1544_p0), %s291_s28, 256  }
  0x79   : > { %1099 = vsyncadd (%p1544_p0), %s291_s28, 4294967040  ;;  %v1135_v0 = vmov 0.0   ;;  %vm1136_vm0 = vmmov 0   ;;  %vm353_vm1 = vcmask 261120   ;;  %v351_v1 = vld [vmem:[%s294_s9] sm:$0xff]  ;;  %v350_v2 = vld [vmem:[%s285_s23] sm:$0xff] }
  0x7a   : > { %794 = vmatprep.subr.mxu0 %v1135_v0  ;;  %796 = vmatprep.mubr.msk.f32.mxu0 %vm1136_vm0, %v1135_v0  ;;  %vm430_vm2 = vcmask 64512   ;;  %s342_s26 = scalar_lea.vmem [#allocation9], %s1367_s16  ;;  %s303_s30 = scalar_lea.vmem [#allocation7], %s1367_s16 }
  0x7b   : > { %799 = vmatprep.subr.mxu1 %v1135_v0  ;;  %801 = vmatprep.mubr.msk.f32.mxu1 %vm1136_vm0, %v1135_v0  ;;  %v352_v12 = vld [vmem:[%s303_s30] sm:$0xff]  ;;  %s349_s7 = scalar_lea.vmem [#allocation11], %s1367_s16  ;;  %s1396_s27 = sshll.u32 %s1122_s21, 7 }
  0x7c   : > { %795 = vmatpush3.xpose.msk.msra.mxu0 %vm353_vm1, %v351_v1  ;;  %800 = vmatpush3.msra.mxu1 %v352_v12  ;;  %s562_s29 = sshll.u32 %s342_s26, 4  ;;  %s1402_s1 = scalar_lea.hbm %s1513_s4, %s1396_s27  ;;  %s563_s29 = int_to_ptr.vmem [resolvable:$true] %s562_s29 }
  0x7d   : > { %s1406_s11 = scalar_lea.sflag [#allocation10], %s290_s12  ;;  %s984_s22 = scalar_lea.vmem %s563_s29, 128 }
  0x7e   : > { %p985_p4 = scmp.ne.s32.totalorder %s563_s29, %s984_s22  ;;  %p1545_p10 = scmp.ne.s32.totalorder %s1531_s6, 0 }
  0x7f   : > { %797 = vmatmul.mubr.msk.f32.vlgmr.msra.gmra.mrb[0].mxu0 %vm353_vm1, %v350_v2  ;;  %s1137_s10 = smov [#allocation9]  }
  0x80   : > { %p986_p12 = pnand %p985_p4, %p1545_p10  ;;  %s988_s13 = sshll.u32 %s1137_s10, 4  ;;  %s989_s13 = int_to_ptr.vmem [resolvable:$false] %s988_s13 }
  0x81   : > { %s990_s21 = scalar_lea.vmem %s989_s13, 256  ;;  %p991_p8 = scmp.lt.s32.totalorder %s563_s29, %s989_s13 }
  0x82   : > { %p987_p1 = pneg %p986_p12  ;;  %p992_p9 = scmp.lt.s32.totalorder %s990_s21, %s984_s22 }
  0x84   : > { %p993_p6 = por %p992_p9, %p991_p8 }
  0x86   : > { %p994_p13 = pnand %p993_p6, %p987_p1 }
 0x152   : > { %v426_v3 = vpop.f32.mrb[0].mxu0 }
 0x153   : > { %431 = vst.msk [vmem:[%s342_s26] sm:$0xff] %vm430_vm2, %v426_v3  ;;  %v798_v4 = vpop.f32.mrb[1].mxu0  ;;  %v432_v5 = vmul.f32 0.17677669, %v426_v3 }
 0x155   : > { %v433_v6 = vsel %vm430_vm2, %v432_v5, -inf }
 0x156   : > { %434 = vmax.xlane.f32.xlu0 %v433_v6 }
 0x1e3   : > { %v435_v7 = vpop.xlane.xlu0 %434 }
 0x1e4   : > { %v436_v8 = vsub.f32 %v432_v5, %v435_v7 }
 0x1e6   : > { %v437_v9 = vmul.f32 1.442695, %v436_v8 }
 0x1e8   : > { %888 = vpow2.f32 %v437_v9 }
 0x1f2   : > { %v889_v10 = vpop.eup %888 }
 0x1f3   : > { %v439_v11 = vsel %vm430_vm2, %v889_v10, 0.0 }
 0x1f4   : > { %440 = vadd.xlane.f32.xlu0 %v439_v11 }
 0x281   : > { %v441_v13 = vpop.xlane.xlu0 %440 }
 0x282   : > { %890 = vrcp.f32 %v441_v13 }
 0x283   : > { %892 = vlog2.f32 %v441_v13 }
 0x28c   : > { %v891_v14 = vpop.eup %890 }
 0x28d   : > { %v893_v15 = vpop.eup %892  ;;  %v444_v16 = vmul.f32 %v891_v14, %v889_v10 }
 0x28e   : > { %v446_v17 = vmul.f32 0.6931472, %v893_v15 }
 0x28f   : > { %802 = vmatmul.mubr.msk.f32.vlgmr.msra.gmra.mrb[0].mxu1 %vm430_vm2, %v444_v16 }
 0x290   : > { %v447_v18 = vsub.f32 %v436_v8, %v446_v17 }
 0x292   : > { %448 = vst.msk [vmem:[%s349_s7] sm:$0xff] %vm430_vm2, %v447_v18 }
 0x293   : > { %997 = shalt.err (!%p994_p13)
}
 0x294   : > { %s998_s24 = scalar_lea.hbm %s1402_s1, 128  ;;  %s1002_s23 = scalar_lea.hbm %s1513_s4, 256 }
 0x295   : > { %p999_p11 = scmp.ne.s32.totalorder %s1402_s1, %s998_s24  ;;  %p1003_p7 = scmp.lt.u32.totalorder %s1402_s1, %s1513_s4 }
 0x296   : > { %p1004_p3 = scmp.lt.u32.totalorder %s1002_s23, %s998_s24  ;;  %p1006_p4 = scmp.lt.u32.totalorder %s998_s24, %s1402_s1 }
 0x297   : > { %p1000_p2 = pnand %p999_p11, %p1545_p10 }
 0x298   : > { %p1005_p0 = por %p1004_p3, %p1003_p7 }
 0x299   : > { %p1001_p5 = pneg %p1000_p2 }
 0x29a   : > { %p1007_p12 = por %p1006_p4, %p1005_p0 }
 0x29c   : > { %p1008_p1 = pnand %p1007_p12, %p1001_p5 }
 0x29e   : > { %1011 = shalt.err (!%p1008_p1)
}
 0x29f   : > { %811 = dma.vmem_to_hbm [thread:$0]  (%p1545_p10), %s563_s29, 128, %s1402_s1, %s1406_s11  }
 0x2a0   : > { %s1430_s30 = scalar_lea.hbm %s1514_s5, %s1396_s27  ;;  %s576_s17 = sshll.u32 %s349_s7, 4  ;;  %s577_s17 = int_to_ptr.vmem [resolvable:$true] %s576_s17 }
 0x2a1   : > { %s1012_s14 = scalar_lea.vmem %s577_s17, 128  ;;  %s1138_s22 = smov [#allocation11]  }
 0x2a2   : > { %p1013_p8 = scmp.ne.s32.totalorder %s577_s17, %s1012_s14  ;;  %s1016_s10 = sshll.u32 %s1138_s22, 4  ;;  %s1017_s10 = int_to_ptr.vmem [resolvable:$false] %s1016_s10 }
 0x2a3   : > { %s1018_s13 = scalar_lea.vmem %s1017_s10, 256  ;;  %p1019_p13 = scmp.lt.s32.totalorder %s577_s17, %s1017_s10 }
 0x2a4   : > { %p1014_p9 = pnand %p1013_p8, %p1545_p10  ;;  %p1020_p11 = scmp.lt.s32.totalorder %s1018_s13, %s1012_s14 }
 0x2a6   : > { %p1015_p6 = pneg %p1014_p9  ;;  %p1021_p2 = por %p1020_p11, %p1019_p13 }
 0x2a8   : > { %p1022_p5 = pnand %p1021_p2, %p1015_p6 }
 0x2aa   : > { %1025 = shalt.err (!%p1022_p5)
}
 0x2ab   : > { %s1026_s7 = scalar_lea.hbm %s1430_s30, 128  ;;  %s1030_s21 = scalar_lea.hbm %s1514_s5, 256 }
 0x2ac   : > { %p1027_p7 = scmp.ne.s32.totalorder %s1430_s30, %s1026_s7  ;;  %p1031_p4 = scmp.lt.u32.totalorder %s1430_s30, %s1514_s5 }
 0x2ad   : > { %p1032_p12 = scmp.lt.u32.totalorder %s1030_s21, %s1026_s7  ;;  %p1034_p8 = scmp.lt.u32.totalorder %s1026_s7, %s1430_s30 }
 0x2ae   : > { %p1028_p3 = pnand %p1027_p7, %p1545_p10 }
 0x2af   : > { %p1033_p1 = por %p1032_p12, %p1031_p4 }
 0x2b0   : > { %p1029_p0 = pneg %p1028_p3 }
 0x2b1   : > { %p1035_p9 = por %p1034_p8, %p1033_p1 }
 0x2b3   : > { %p1036_p6 = pnand %p1035_p9, %p1029_p0 }
 0x2b5   : > { %1039 = shalt.err (!%p1036_p6)
}
 0x2b6   : > { %812 = dma.vmem_to_hbm [thread:$0]  (%p1545_p10), %s577_s17, 128, %s1430_s30, %s1406_s11  }
 0x2b7   : > { %s335_s8 = scalar_lea.vmem [#allocation8], %s1367_s16  ;;  %s1457_s9 = scalar_lea.hbm %s1512_s3, %s1396_s27 }
 0x2b8   : > { %s548_s23 = sshll.u32 %s335_s8, 4  ;;  %s524_s26 = scalar_lea.sflag [#allocation4], %s1364_s25  ;;  %s1459_s23 = int_to_ptr.vmem [resolvable:$true] %s548_s23 }
 0x2b9   : > { %s1040_s14 = scalar_lea.vmem %s1459_s23, 128  ;;  %s1139_s16 = smov [#allocation8]  }
 0x2ba   : > { %p1041_p13 = scmp.ne.s32.totalorder %s1459_s23, %s1040_s14  ;;  %s1044_s11 = sshll.u32 %s1139_s16, 4  ;;  %s1045_s11 = int_to_ptr.vmem [resolvable:$false] %s1044_s11 }
 0x2bb   : > { %s1046_s27 = scalar_lea.vmem %s1045_s11, 256  ;;  %p1047_p5 = scmp.lt.s32.totalorder %s1459_s23, %s1045_s11 }
 0x2bc   : > { %p1042_p11 = pnand %p1041_p13, %p1545_p10  ;;  %p1048_p7 = scmp.lt.s32.totalorder %s1046_s27, %s1040_s14 }
 0x2be   : > { %p1043_p2 = pneg %p1042_p11  ;;  %p1049_p3 = por %p1048_p7, %p1047_p5 }
 0x2c0   : > { %p1050_p0 = pnand %p1049_p3, %p1043_p2 }
 0x362   : > { %v518_v19 = vpop.f32.mrb[0].mxu1 }
 0x363   : > { %522 = vst.msk [vmem:[%s335_s8] sm:$0xff] %vm353_vm1, %v518_v19  ;;  %v803_v20 = vpop.f32.mrb[1].mxu1 }
 0x364   : > { %1053 = shalt.err (!%p1050_p0)
}
 0x365   : > { %s1054_s25 = scalar_lea.hbm %s1457_s9, 128  ;;  %s1058_s22 = scalar_lea.hbm %s1512_s3, 256 }
 0x366   : > { %p1055_p4 = scmp.ne.s32.totalorder %s1457_s9, %s1054_s25  ;;  %p1059_p8 = scmp.lt.u32.totalorder %s1457_s9, %s1512_s3 }
 0x367   : > { %p1060_p9 = scmp.lt.u32.totalorder %s1058_s22, %s1054_s25  ;;  %p1062_p13 = scmp.lt.u32.totalorder %s1054_s25, %s1457_s9 }
 0x368   : > { %p1056_p12 = pnand %p1055_p4, %p1545_p10 }
 0x369   : > { %p1061_p6 = por %p1060_p9, %p1059_p8 }
 0x36a   : > { %p1057_p1 = pneg %p1056_p12 }
 0x36b   : > { %p1063_p11 = por %p1062_p13, %p1061_p6 }
 0x36d   : > { %p1064_p2 = pnand %p1063_p11, %p1057_p1 }
 0x36f   : > { %1067 = shalt.err (!%p1064_p2)
}
 0x370   : > { %810 = dma.vmem_to_hbm [thread:$0]  (%p1545_p10), %s1459_s23, 128, %s1457_s9, %s524_s26  }
 0x371 PF: > { %s1546_s7 = sld [smem:[#allocation20_spill]]  ;;  %s1547_s29 = sld [smem:[#allocation17_spill]] }
 0x372   : > { %s588_s1 = sand.u32 1, %s1110_s18  }
 0x373   : > { %s589_s21 = scalar_lea.sflag [#allocation4], %s588_s1 }
 0x377   : > { %p1548_p5 = scmp.ne.s32.totalorder %s1546_s7, 0  ;;  %p1549_p7 = scmp.ge.s32.totalorder %s1547_s29, 2 }
 0x379   : > { %p827_p3 = pnand %p1549_p7, %p1548_p5 }
 0x37b   : > { %1101 = dma.done.wait (!%p827_p3), %s589_s21, 128  }
 0x37c   : > { %1103 = vsyncadd (!%p827_p3), %s589_s21, 4294967168  ;;  %s1550_s24 = sadd.s32 4294967294, %s1547_s29  }
 0x37d   : > { %s597_s15 = sand.u32 1, %s1550_s24  }
 0x37e   : > { %s598_s8 = scalar_lea.sflag [#allocation10], %s597_s15 }
 0x37f   : > { %1105 = dma.done.wait (!%p827_p3), %s598_s8, 256  }
 0x380   : > { %1107 = vsyncadd (!%p827_p3), %s598_s8, 4294967040  ;;  %s28_s23 = sadd.s32 1, %s1547_s29   ;;  %s1551_s6 = sld [smem:[#allocation19_spill]] }
 0x381   : > { %p25_p10 = scmp.ge.s32.totalorder %s28_s23, 4   ;;  %s1552_s21 = sld [smem:[#allocation16_spill]] }
 0x382   : > { %s1553_s22 = sld [smem:[#allocation18_spill]]  ;;  %s1554_s18 = smov %s1114_s19 }
 0x383   : > { %s1555_s19 = smov %s1118_s20  ;;  %27 = sbr.rel (!%p25_p10) target bundleno = 12 (0xc), region = 133 }
 0x386   : > { %s1556_s20 = smov %s1551_s6 }
 0x38a   :  { %612 = vsyncpa [#allocation3], 1 }
 0x38b   :  { %614 = vsyncpa [#allocation3 + $0x1], 1 }
 0x38c   :  { %615 = vsyncpa [#allocation6], 1 }
 0x38d   :  { %617 = vsyncpa [#allocation6 + $0x1], 1 }
 0x38e   :  { %618 = vsyncpa [#allocation4], 1 }
 0x38f   :  { %620 = vsyncpa [#allocation4 + $0x1], 1 }
 0x390   :  { %621 = vsyncpa [#allocation10], 1 }
 0x391   :  { %623 = vsyncpa [#allocation10 + $0x1], 1 }

</bundles_post_ra>
